<compile_context>
chip_gen: v7x
topology: tpu7x:2x2x1
jax: 0.10.0
libtpu: 0.0.40
codegen_flags: <defaults>
</compile_context>

<pallas_src>
import jax
import jax.numpy as jnp
from jax.experimental import pallas as pl
from jax.experimental.pallas import tpu as pltpu

N_COMN = 2
COS_EPS = 1e-8  # torch.nn.CosineSimilarity default eps


def _round_up(v, m):
    return (v + m - 1) // m * m


def _vmem_capacity_bytes():
    """Physical VMEM per TensorCore; conservative v7x-like fallback."""
    try:
        info = pltpu.get_tpu_info()
        cap = getattr(info, "vmem_capacity_bytes", None)
        if cap:
            return int(cap)
    except Exception:
        pass
    return 64 << 20


def _make_kernel(n_slices, n_comn, d, folded):
    cos_scale = 0.1 / float(n_comn)
    eps2 = COS_EPS * COS_EPS

    def kernel(x_ref, t_ref, a_ref, out_ref):
        # ---- fused soft-target cross entropy over this batch tile -----------------
        x = x_ref[...].astype(jnp.float32)                  # (TILE_B, N)
        t = t_ref[...].astype(jnp.float32)                  # (TILE_B, N)
        m = jnp.max(x, axis=-1, keepdims=True)
        z = x - m
        lse = jnp.log(jnp.sum(jnp.exp(z), axis=-1, keepdims=True))
        t_sum = jnp.sum(t, axis=-1, keepdims=True)
        tz = jnp.sum(t * z, axis=-1, keepdims=True)
        # sum(-t * (z - lse)) == lse * sum(t) - sum(t * z); zero-padded rows give 0.
        ce_sum = jnp.sum(lse * t_sum - tz)
        # TODO(synk): for very large N (esp. v7x 64 MiB VMEM) add a class-axis grid
        #             with online logsumexp and offload these reductions to the MXU.

        # ---- cosine-similarity chain: per-slice norms once, no 3-D slice copies ----
        if folded:
            a = a_ref[...].astype(jnp.float32)              # (TILE_B, n_slices*D)
            slices = [a[:, i * d:(i + 1) * d] for i in range(n_slices)]
        else:
            slices = [a_ref[i].astype(jnp.float32) for i in range(n_slices)]
        norms2 = [jnp.maximum(jnp.sum(s * s, axis=-1, keepdims=True), eps2)
                  for s in slices]
        cos_sum = jnp.float32(0.0)
        for i in range(n_comn):
            num = jnp.sum(slices[i] * slices[i + 1], axis=-1, keepdims=True)
            inv = jax.lax.rsqrt(norms2[i] * norms2[i + 1])  # EUP rsqrt (free-ish slot)
            cos_sum = cos_sum + jnp.sum(num * inv)          # padded rows -> num==0 -> 0

        # ---- one merged, lane-dense partial per tile (exact single nonzero elem) ---
        partial = ce_sum + cos_scale * cos_sum
        row = jax.lax.broadcasted_iota(jnp.int32, out_ref.shape, 0)
        col = jax.lax.broadcasted_iota(jnp.int32, out_ref.shape, 1)
        out_ref[...] = jnp.where((row == 0) & (col == 0), partial, 0.0)

    return kernel


def soft_target_ce_cos_reg(x, target, atten, *, tile_b=None):
    """Pallas implementation of SoftTargetCrossEntropyCosReg(n_comn).forward.

    x, target : (B, N)           logits / soft targets (class axis last)
    atten     : (n_comn+1, B, D) attention slices; cosine taken between consecutive
    """
    B, N = x.shape
    n_slices, b_a, D = atten.shape
    assert b_a == B, "atten batch dim must match x"
    n_comn = n_slices - 1

    x_item = jnp.dtype(x.dtype).itemsize
    t_item = jnp.dtype(target.dtype).itemsize
    a_item = jnp.dtype(atten.dtype).itemsize

    # Fold the slice axis into lanes when D would waste most of a 128-lane tile.
    folded = D < 128
    if folded:
        atten_in = jnp.transpose(atten, (1, 0, 2)).reshape(B, n_slices * D)
        a_lanes = _round_up(n_slices * D, 128)
    else:
        atten_in = atten
        a_lanes = n_slices * _round_up(D, 128)
    n_lanes = _round_up(N, 128)

    # ---- per-generation VMEM budgets -------------------------------------------
    vmem_cap = _vmem_capacity_bytes()
    small_vmem = vmem_cap <= (64 << 20)                 # v7x-like: 64 MiB/TC, 2 TCs
    vmem_limit = max(32 << 20, (vmem_cap * 3) // 4)     # ~48 MiB v7x, ~96 MiB v5e/v6e
    budget = max(16 << 20, vmem_limit - (12 << 20))     # headroom for Pallas internals

    # Real per-batch-row VMEM (bytes), counting lane padding:
    #   * 2x (double-buffered) input tiles for x, target, atten
    #   * f32 working set: upcasts of x/t, exp(z), t*z, and atten f32 copies
    in_row = n_lanes * (x_item + t_item) + a_lanes * a_item
    work_row = 4 * n_lanes * 4 + 2 * a_lanes * 4
    per_row = 2 * in_row + work_row

    b_pad8 = _round_up(B, 8)
    if tile_b is None:
        tile_b = max(8, (budget // max(per_row, 1)) // 8 * 8)   # bytes-driven, no row cap
        tile_b = min(tile_b, b_pad8)
        # v7x: keep both TensorCores busy -> at least 2 grid steps when possible.
        if small_vmem and tile_b >= b_pad8 and b_pad8 >= 16:
            tile_b = _round_up((b_pad8 + 1) // 2, 8)
    tile_b = min(_round_up(int(tile_b), 8), b_pad8)

    b_pad = _round_up(B, tile_b)
    num_tiles = b_pad // tile_b

    if b_pad != B:
        pad = b_pad - B
        x = jnp.pad(x, ((0, pad), (0, 0)))
        target = jnp.pad(target, ((0, pad), (0, 0)))
        if folded:
            atten_in = jnp.pad(atten_in, ((0, pad), (0, 0)))
        else:
            atten_in = jnp.pad(atten_in, ((0, 0), (0, pad), (0, 0)))

    if folded:
        atten_spec = pl.BlockSpec((tile_b, n_slices * D), lambda i: (i, 0))
    else:
        atten_spec = pl.BlockSpec((n_slices, tile_b, D), lambda i: (0, i, 0))

    kernel = _make_kernel(n_slices, n_comn, D, folded)

    parts = pl.pallas_call(
        kernel,
        out_shape=jax.ShapeDtypeStruct((num_tiles * 8, 128), jnp.float32),
        grid=(num_tiles,),
        in_specs=[
            pl.BlockSpec((tile_b, N), lambda i: (i, 0)),
            pl.BlockSpec((tile_b, N), lambda i: (i, 0)),
            atten_spec,
        ],
        out_specs=pl.BlockSpec((8, 128), lambda i: (i, 0)),
        compiler_params=pltpu.CompilerParams(
            dimension_semantics=("parallel",),
            vmem_limit_bytes=int(vmem_limit),
        ),
    )(x, target, atten_in)

    # Each tile's (8,128) block holds exactly one nonzero element (the merged
    # ce + 0.1*cos/n_comn partial), so a single full-block sum is exact.  Finish
    # the means against the *real* batch size here.
    total = jnp.sum(parts)
    return total / B


def _reference(x, target, atten):
    # pure-JAX reference (matches torch: per-norm eps clamp in CosineSimilarity)
    logp = jax.nn.log_softmax(x.astype(jnp.float32), axis=-1)
    loss = jnp.sum(-target.astype(jnp.float32) * logp, axis=-1)
    n_comn = atten.shape[0] - 1
    cos_loss = 0.0
    for i in range(n_comn):
        a = atten[i].astype(jnp.float32)
        b = atten[i + 1].astype(jnp.float32)
        na = jnp.maximum(jnp.linalg.norm(a, axis=1), COS_EPS)
        nb = jnp.maximum(jnp.linalg.norm(b, axis=1), COS_EPS)
        cos_loss = cos_loss + jnp.sum(a * b, axis=1) / (na * nb)
    return jnp.mean(loss) + 0.1 * jnp.mean(cos_loss) / n_comn


if __name__ == "__main__":
    key = jax.random.PRNGKey(0)
    k1, k2, k3 = jax.random.split(key, 3)

    # Case 1: small single-tile shapes (D=16 -> lane-folded atten path).
    B, N, D = 8, 32, 16
    x = jax.random.normal(k1, (B, N), dtype=jnp.float32)
    target = jax.nn.softmax(jax.random.normal(k2, (B, N), dtype=jnp.float32), axis=-1)
    atten = jax.random.normal(k3, (N_COMN + 1, B, D), dtype=jnp.float32)

    out = jax.block_until_ready(soft_target_ce_cos_reg(x, target, atten))
    ref = _reference(x, target, atten)
    assert jnp.allclose(out, ref, atol=1e-5, rtol=1e-5), (out, ref)

    # Case 2: multi-tile grid + batch padding path (B=20 -> padded to 24, 3 tiles).
    k4, k5, k6 = jax.random.split(jax.random.PRNGKey(1), 3)
    B2 = 20
    x2 = jax.random.normal(k4, (B2, N), dtype=jnp.float32)
    target2 = jax.nn.softmax(jax.random.normal(k5, (B2, N), dtype=jnp.float32), axis=-1)
    atten2 = jax.random.normal(k6, (N_COMN + 1, B2, D), dtype=jnp.float32)

    out2 = jax.block_until_ready(
        soft_target_ce_cos_reg(x2, target2, atten2, tile_b=8)
    )
    ref2 = _reference(x2, target2, atten2)
    assert jnp.allclose(out2, ref2, atol=1e-5, rtol=1e-5), (out2, ref2)

    print("KERNEL_OK")
</pallas_src>

<mosaic_0001>
module attributes {stable_mosaic.version = 11 : i64} {
  func.func @kernel(%arg0: i32, %arg1: memref<8x32xf32, #tpu.memory_space<vmem>>, %arg2: memref<8x32xf32, #tpu.memory_space<vmem>>, %arg3: memref<8x48xf32, #tpu.memory_space<vmem>>, %arg4: memref<8x128xf32, #tpu.memory_space<vmem>>) attributes {dimension_semantics = [#tpu.dimension_semantics<parallel>], iteration_bounds = array<i64: 1>, scalar_prefetch = 0 : i64, scratch_operands = 0 : i64, tpu.core_type = #tpu.core_type<tc>, window_params = [{transform_indices = @transform_0, window_bounds = array<i64: 8, 32>}, {transform_indices = @transform_1, window_bounds = array<i64: 8, 32>}, {transform_indices = @transform_2, window_bounds = array<i64: 8, 48>}, {transform_indices = @transform_3, window_bounds = array<i64: 8, 128>}]} {
    %c0 = arith.constant 0 : index
    %c0_0 = arith.constant 0 : index
    %0 = vector.load %arg1[%c0, %c0_0] : memref<8x32xf32, #tpu.memory_space<vmem>>, vector<8x32xf32>
    %c0_1 = arith.constant 0 : index
    %c0_2 = arith.constant 0 : index
    %1 = vector.load %arg2[%c0_1, %c0_2] : memref<8x32xf32, #tpu.memory_space<vmem>>, vector<8x32xf32>
    %cst = arith.constant dense<0xFF800000> : vector<8xf32>
    %2 = vector.multi_reduction <maximumf>, %0, %cst [1] : vector<8x32xf32> to vector<8xf32>
    %3 = vector.shape_cast %2 : vector<8xf32> to vector<8x1xf32>
    %4 = vector.broadcast %3 : vector<8x1xf32> to vector<8x32xf32>
    %5 = arith.subf %0, %4 : vector<8x32xf32>
    %6 = math.exp %5 : vector<8x32xf32>
    %cst_3 = arith.constant dense<0.000000e+00> : vector<8xf32>
    %7 = vector.multi_reduction <add>, %6, %cst_3 [1] : vector<8x32xf32> to vector<8xf32>
    %8 = vector.shape_cast %7 : vector<8xf32> to vector<8x1xf32>
    %9 = math.log %8 : vector<8x1xf32>
    %cst_4 = arith.constant dense<0.000000e+00> : vector<8xf32>
    %10 = vector.multi_reduction <add>, %1, %cst_4 [1] : vector<8x32xf32> to vector<8xf32>
    %11 = vector.shape_cast %10 : vector<8xf32> to vector<8x1xf32>
    %12 = arith.mulf %1, %5 : vector<8x32xf32>
    %cst_5 = arith.constant dense<0.000000e+00> : vector<8xf32>
    %13 = vector.multi_reduction <add>, %12, %cst_5 [1] : vector<8x32xf32> to vector<8xf32>
    %14 = vector.shape_cast %13 : vector<8xf32> to vector<8x1xf32>
    %15 = arith.mulf %9, %11 : vector<8x1xf32>
    %16 = arith.subf %15, %14 : vector<8x1xf32>
    %17 = vector.shape_cast %16 : vector<8x1xf32> to vector<1x8x1xf32>
    %cst_6 = arith.constant dense<0.000000e+00> : vector<1xf32>
    %18 = vector.multi_reduction <add>, %17, %cst_6 [1, 2] : vector<1x8x1xf32> to vector<1xf32>
    %19 = vector.shape_cast %18 : vector<1xf32> to vector<1x1x1xf32>
    %20 = vector.extract %19[0, 0, 0] : f32 from vector<1x1x1xf32>
    %c0_7 = arith.constant 0 : index
    %c0_8 = arith.constant 0 : index
    %21 = vector.load %arg3[%c0_7, %c0_8] : memref<8x48xf32, #tpu.memory_space<vmem>>, vector<8x48xf32>
    %22 = vector.extract_strided_slice %21 {offsets = [0, 0], sizes = [8, 16], strides = [1, 1]} : vector<8x48xf32> to vector<8x16xf32>
    %23 = vector.extract_strided_slice %21 {offsets = [0, 16], sizes = [8, 16], strides = [1, 1]} : vector<8x48xf32> to vector<8x16xf32>
    %24 = vector.extract_strided_slice %21 {offsets = [0, 32], sizes = [8, 16], strides = [1, 1]} : vector<8x48xf32> to vector<8x16xf32>
    %25 = arith.mulf %22, %22 : vector<8x16xf32>
    %cst_9 = arith.constant dense<0.000000e+00> : vector<8xf32>
    %26 = vector.multi_reduction <add>, %25, %cst_9 [1] : vector<8x16xf32> to vector<8xf32>
    %27 = vector.shape_cast %26 : vector<8xf32> to vector<8x1xf32>
    %cst_10 = arith.constant 1.000000e-16 : f32
    %28 = vector.broadcast %cst_10 : f32 to vector<8x1xf32>
    %29 = arith.maximumf %27, %28 : vector<8x1xf32>
    %30 = arith.mulf %23, %23 : vector<8x16xf32>
    %cst_11 = arith.constant dense<0.000000e+00> : vector<8xf32>
    %31 = vector.multi_reduction <add>, %30, %cst_11 [1] : vector<8x16xf32> to vector<8xf32>
    %32 = vector.shape_cast %31 : vector<8xf32> to vector<8x1xf32>
    %cst_12 = arith.constant 1.000000e-16 : f32
    %33 = vector.broadcast %cst_12 : f32 to vector<8x1xf32>
    %34 = arith.maximumf %32, %33 : vector<8x1xf32>
    %35 = arith.mulf %24, %24 : vector<8x16xf32>
    %cst_13 = arith.constant dense<0.000000e+00> : vector<8xf32>
    %36 = vector.multi_reduction <add>, %35, %cst_13 [1] : vector<8x16xf32> to vector<8xf32>
    %37 = vector.shape_cast %36 : vector<8xf32> to vector<8x1xf32>
    %cst_14 = arith.constant 1.000000e-16 : f32
    %38 = vector.broadcast %cst_14 : f32 to vector<8x1xf32>
    %39 = arith.maximumf %37, %38 : vector<8x1xf32>
    %40 = arith.mulf %22, %23 : vector<8x16xf32>
    %cst_15 = arith.constant dense<0.000000e+00> : vector<8xf32>
    %41 = vector.multi_reduction <add>, %40, %cst_15 [1] : vector<8x16xf32> to vector<8xf32>
    %42 = vector.shape_cast %41 : vector<8xf32> to vector<8x1xf32>
    %43 = arith.mulf %29, %34 : vector<8x1xf32>
    %44 = math.rsqrt %43 : vector<8x1xf32>
    %45 = arith.mulf %42, %44 : vector<8x1xf32>
    %46 = vector.shape_cast %45 : vector<8x1xf32> to vector<1x8x1xf32>
    %cst_16 = arith.constant dense<0.000000e+00> : vector<1xf32>
    %47 = vector.multi_reduction <add>, %46, %cst_16 [1, 2] : vector<1x8x1xf32> to vector<1xf32>
    %48 = vector.shape_cast %47 : vector<1xf32> to vector<1x1x1xf32>
    %49 = vector.extract %48[0, 0, 0] : f32 from vector<1x1x1xf32>
    %cst_17 = arith.constant 0.000000e+00 : f32
    %50 = arith.addf %cst_17, %49 : f32
    %51 = arith.mulf %23, %24 : vector<8x16xf32>
    %cst_18 = arith.constant dense<0.000000e+00> : vector<8xf32>
    %52 = vector.multi_reduction <add>, %51, %cst_18 [1] : vector<8x16xf32> to vector<8xf32>
    %53 = vector.shape_cast %52 : vector<8xf32> to vector<8x1xf32>
    %54 = arith.mulf %34, %39 : vector<8x1xf32>
    %55 = math.rsqrt %54 : vector<8x1xf32>
    %56 = arith.mulf %53, %55 : vector<8x1xf32>
    %57 = vector.shape_cast %56 : vector<8x1xf32> to vector<1x8x1xf32>
    %cst_19 = arith.constant dense<0.000000e+00> : vector<1xf32>
    %58 = vector.multi_reduction <add>, %57, %cst_19 [1, 2] : vector<1x8x1xf32> to vector<1xf32>
    %59 = vector.shape_cast %58 : vector<1xf32> to vector<1x1x1xf32>
    %60 = vector.extract %59[0, 0, 0] : f32 from vector<1x1x1xf32>
    %61 = arith.addf %50, %60 : f32
    %cst_20 = arith.constant 5.000000e-02 : f32
    %62 = arith.mulf %cst_20, %61 : f32
    %63 = arith.addf %20, %62 : f32
    %64 = tpu.iota {dimensions = array<i32: 0>} : vector<8x128xi32>
    %65 = tpu.iota {dimensions = array<i32: 1>} : vector<8x128xi32>
    %c0_i32 = arith.constant 0 : i32
    %66 = vector.broadcast %c0_i32 : i32 to vector<8x128xi32>
    %67 = arith.cmpi eq, %64, %66 : vector<8x128xi32>
    %c0_i32_21 = arith.constant 0 : i32
    %68 = vector.broadcast %c0_i32_21 : i32 to vector<8x128xi32>
    %69 = arith.cmpi eq, %65, %68 : vector<8x128xi32>
    %70 = arith.andi %67, %69 : vector<8x128xi1>
    %cst_22 = arith.constant 0.000000e+00 : f32
    %71 = vector.broadcast %63 : f32 to vector<8x128xf32>
    %72 = vector.broadcast %cst_22 : f32 to vector<8x128xf32>
    %73 = arith.select %70, %71, %72 : vector<8x128xi1>, vector<8x128xf32>
    %c0_23 = arith.constant 0 : index
    %c0_24 = arith.constant 0 : index
    %74 = vector.load %arg4[%c0_23, %c0_24] : memref<8x128xf32, #tpu.memory_space<vmem>>, vector<8x128xf32>
    tpu.vector_store %arg4[%c0_23, %c0_24], %73 {strides = array<i32>} : memref<8x128xf32, #tpu.memory_space<vmem>>, vector<8x128xf32>,
    return
  }
  func.func @transform_0(%arg0: i32) -> (i32, i32) {
    %c0_i32 = arith.constant 0 : i32
    %c0_i32_0 = arith.constant 0 : i32
    return %arg0, %c0_i32 : i32, i32
  }
  func.func @transform_1(%arg0: i32) -> (i32, i32) {
    %c0_i32 = arith.constant 0 : i32
    %c0_i32_0 = arith.constant 0 : i32
    return %arg0, %c0_i32 : i32, i32
  }
  func.func @transform_2(%arg0: i32) -> (i32, i32) {
    %c0_i32 = arith.constant 0 : i32
    %c0_i32_0 = arith.constant 0 : i32
    return %arg0, %c0_i32 : i32, i32
  }
  func.func @transform_3(%arg0: i32) -> (i32, i32) {
    %c0_i32 = arith.constant 0 : i32
    %c0_i32_0 = arith.constant 0 : i32
    return %arg0, %c0_i32 : i32, i32
  }
}

</mosaic_0001>

<bundles_post_ra>
// kernel: tpu_custom_call.1
= control target key start
LH: loop header
LB: loop body
LE: loop exit
PB: predicated region body
PF: predicated region fallthrough
CT: control target
= control target key end

     0   :  { %8 = vsyncpa [#allocation3], 0  ;;  %s377_s0 = inlined_call_operand.hbm [shape: f32[8,32], index: 0, kind: input, shape index: {}]   ;;  %s378_s1 = inlined_call_operand.hbm [shape: f32[8,32], index: 1, kind: input, shape index: {}]   ;;  %s379_s2 = inlined_call_operand.hbm [shape: f32[8,48], index: 2, kind: input, shape index: {}]   ;;  %s380_s3 = inlined_call_operand.hbm [shape: f32[8,128], index: 3, kind: output, shape index: {}]  }
   0x1   :  { %9 = vsyncpa [#allocation6], 0 }
   0x2   :  { %10 = vsyncpa [#allocation4], 0  ;;  %s291_s12 = smov [#allocation5]   ;;  %s292_s14 = smov [#allocation2]  }
   0x3   :  { %s27_s13 = sshll.u32 %s291_s12, 4  ;;  %s17_s15 = sshll.u32 %s292_s14, 4  ;;  %s28_s13 = int_to_ptr.vmem [resolvable:$true] %s27_s13  ;;  %s18_s15 = int_to_ptr.vmem [resolvable:$true] %s17_s15 }
   0x4   :  { %s197_s18 = scalar_lea.hbm %s378_s1, 128 }
   0x5   :  { %p198_p0 = scmp.ne.s32.totalorder %s378_s1, %s197_s18  ;;  %p201_p1 = scmp.lt.u32.totalorder %s197_s18, %s378_s1 }
   0x7   :  { %p203_p2 = pnand %p201_p1, %p198_p0 }
   0x9   :  { %206 = shalt.err (!%p203_p2)
}
   0xa   :  { %s207_s23 = scalar_lea.vmem %s28_s13, 128  ;;  %p212_p4 = scmp.lt.s32.totalorder %s28_s13, %s28_s13 }
   0xb   :  { %p208_p3 = scmp.ne.s32.totalorder %s28_s13, %s207_s23  ;;  %p213_p5 = scmp.lt.s32.totalorder %s207_s23, %s207_s23 }
   0xd   :  { %p214_p6 = por %p213_p5, %p212_p4 }
   0xf   :  { %p215_p7 = pnand %p214_p6, %p208_p3 }
  0x11   :  { %218 = shalt.err (!%p215_p7)
}
  0x12   :  { %30 = dma.hbm_to_vmem [thread:$0]  %s378_s1, 128, %s28_s13, [#allocation6]  }
  0x13   :  { %s219_s28 = scalar_lea.hbm %s377_s0, 128 }
  0x14   :  { %p220_p8 = scmp.ne.s32.totalorder %s377_s0, %s219_s28  ;;  %p223_p9 = scmp.lt.u32.totalorder %s219_s28, %s377_s0 }
  0x16   :  { %p225_p10 = pnand %p223_p9, %p220_p8 }
  0x18   :  { %228 = shalt.err (!%p225_p10)
}
  0x19   :  { %s229_s6 = scalar_lea.vmem %s18_s15, 128  ;;  %p234_p12 = scmp.lt.s32.totalorder %s18_s15, %s18_s15 }
  0x1a   :  { %p230_p11 = scmp.ne.s32.totalorder %s18_s15, %s229_s6  ;;  %p235_p13 = scmp.lt.s32.totalorder %s229_s6, %s229_s6 }
  0x1c   :  { %p236_p0 = por %p235_p13, %p234_p12 }
  0x1e   :  { %p237_p1 = pnand %p236_p0, %p230_p11 }
  0x20   :  { %240 = shalt.err (!%p237_p1)
}
  0x21   :  { %20 = dma.hbm_to_vmem [thread:$0]  %s377_s0, 128, %s18_s15, [#allocation3]  }
  0x22   :  { %s293_s8 = smov [#allocation7]   ;;  %s241_s12 = scalar_lea.hbm %s379_s2, 128 }
  0x23   :  { %s37_s9 = sshll.u32 %s293_s8, 4  ;;  %p242_p2 = scmp.ne.s32.totalorder %s379_s2, %s241_s12  ;;  %s38_s9 = int_to_ptr.vmem [resolvable:$true] %s37_s9 }
  0x24   :  { %p245_p3 = scmp.lt.u32.totalorder %s241_s12, %s379_s2 }
  0x26   :  { %p247_p4 = pnand %p245_p3, %p242_p2 }
  0x28   :  { %250 = shalt.err (!%p247_p4)
}
  0x29   :  { %s251_s18 = scalar_lea.vmem %s38_s9, 128  ;;  %p256_p6 = scmp.lt.s32.totalorder %s38_s9, %s38_s9 }
  0x2a   :  { %p252_p5 = scmp.ne.s32.totalorder %s38_s9, %s251_s18  ;;  %p257_p7 = scmp.lt.s32.totalorder %s251_s18, %s251_s18 }
  0x2c   :  { %p258_p8 = por %p257_p7, %p256_p6 }
  0x2e   :  { %p259_p9 = pnand %p258_p8, %p252_p5 }
  0x30   :  { %262 = shalt.err (!%p259_p9)
}
  0x31   :  { %40 = dma.hbm_to_vmem [thread:$0]  %s379_s2, 128, %s38_s9, [#allocation6]  }
  0x32   :  { %285 = dma.done.wait [#allocation3], 128  }
  0x33   :  { %286 = vsyncadd [#allocation3], 4294967168 }
  0x34   :  { %287 = dma.done.wait [#allocation6], 256  }
  0x35   :  { %288 = vsyncadd [#allocation6], 4294967040  ;;  %v84_v0 = vld [vmem:[#allocation7] sm:$0xff]  ;;  %s294_s19 = smov 112   ;;  %s295_s20 = smov 96   ;;  %v50_v2 = vld [vmem:[#allocation2] sm:$0xff] }
  0x36   :  { %107 = vrot.lane.b32.xlu0 %v84_v0, %s294_s19  ;;  %v85_v1 = vmul.f32 %v84_v0, %v84_v0  ;;  %vm52_vm0 = vcmask 261120   ;;  %vm86_vm1 = vcmask 130048   ;;  %v51_v10 = vld [vmem:[#allocation5] sm:$0xff]  ;;  %vm73_vm2 = vcmask 7168   ;;  %s296_s25 = smov [#allocation8]  }
  0x37   :  { %v53_v3 = vsel %vm52_vm0, %v50_v2, -inf  ;;  %v64_v12 = vsel %vm52_vm0, %v51_v10, 0.0  ;;  %s167_s26 = sshll.u32 %s296_s25, 4  ;;  %s168_s26 = int_to_ptr.vmem [resolvable:$true] %s167_s26 }
  0x38   :  { %92 = vrot.lane.b32.xlu1 %v85_v1, %s294_s19  ;;  %v87_v4 = vsel %vm86_vm1, %v85_v1, 0.0  ;;  %s263_s28 = scalar_lea.vmem %s168_s26, 128  ;;  %p268_p11 = scmp.lt.s32.totalorder %s168_s26, %s168_s26 }
  0x39   :  { %p264_p10 = scmp.ne.s32.totalorder %s168_s26, %s263_s28  ;;  %p269_p12 = scmp.lt.s32.totalorder %s263_s28, %s263_s28 }
  0x3b   :  { %p270_p13 = por %p269_p12, %p268_p11 }
  0x3c   :  { %99 = vrot.lane.b32.xlu1 %v85_v1, %s295_s20 }
  0x3d   :  { %p271_p0 = pnand %p270_p13, %p264_p10 }
  0x55   :  { %54 = vmax.xlane.f32.xlu0 %v53_v3 }
  0x59   :  { %88 = vadd.xlane.f32.xlu0 %v87_v4  ;;  %v151_v4 = vlaneseq }
  0xa8   :  { %v108_v5 = vpop.permute.xlu0 %107 }
  0xa9   :  { %v110_v6 = vmul.f32 %v108_v5, %v84_v0  ;;  %v152_v5 = vshrl.u32 %v151_v4, 7 }
  0xaa   :  { %v93_v7 = vpop.permute.xlu1 %92 }
  0xab   :  { %129 = vrot.lane.b32.xlu1 %v110_v6, %s294_s19  ;;  %v95_v8 = vsel %vm86_vm1, %v93_v7, 0.0  ;;  %v111_v13 = vsel %vm86_vm1, %v110_v6, 0.0  ;;  %v154_v6 = vand.u32 127, %v151_v4  ;;  %vm155_vm3 = vcmp.eq.s32.totalorder %v152_v5, 0 }
  0xac   :  { %96 = vadd.xlane.f32.xlu0 %v95_v8 }
  0xad   :  { %vm156_vm4 = vcmp.eq.s32.totalorder %v154_v6, 0 }
  0xae   :  { %v100_v9 = vpop.permute.xlu1 %99  ;;  %vm157_vm5 = vmand %vm155_vm3, %vm156_vm4 }
  0xaf   :  { %v102_v11 = vsel %vm86_vm1, %v100_v9, 0.0 }
  0xb0   :  { %103 = vadd.xlane.f32.xlu0 %v102_v11 }
  0xb4   :  { %65 = vadd.xlane.f32.xlu0 %v64_v12 }
  0xb8   :  { %112 = vadd.xlane.f32.xlu0 %v111_v13 }
  0xe2   :  { %v55_v14 = vpop.xlane.xlu0 %54 }
  0xe3   :  { %v56_v15 = vsub.f32 %v50_v2, %v55_v14 }
  0xe5   :  { %v57_v16 = vmul.f32 1.442695, %v56_v15  ;;  %v67_v17 = vmul.f32 %v56_v15, %v51_v10 }
  0xe6   :  { %v89_v23 = vpop.xlane.xlu0 %88 }
  0xe7   :  { %189 = vpow2.f32 %v57_v16  ;;  %v68_v20 = vsel %vm52_vm0, %v67_v17, 0.0  ;;  %v90_v24 = vmax.f32 %v89_v23, 1e-16 }
  0xf1   :  { %v190_v18 = vpop.eup %189 }
  0xf2   :  { %v59_v19 = vsel %vm52_vm0, %v190_v18, 0.0 }
  0xf3   :  { %60 = vadd.xlane.f32.xlu1 %v59_v19 }
  0xf7   :  { %69 = vadd.xlane.f32.xlu1 %v68_v20 }
 0x11d   :  { %v130_v21 = vpop.permute.xlu1 %129 }
 0x11e   :  { %v132_v22 = vsel %vm86_vm1, %v130_v21, 0.0 }
 0x11f   :  { %133 = vadd.xlane.f32.xlu1 %v132_v22 }
 0x139   :  { %v97_v25 = vpop.xlane.xlu0 %96 }
 0x13a   :  { %v98_v26 = vmax.f32 %v97_v25, 1e-16 }
 0x13c   :  { %v114_v27 = vmul.f32 %v98_v26, %v90_v24 }
 0x13d   :  { %v104_v28 = vpop.xlane.xlu0 %103 }
 0x13e   :  { %191 = vrsqrt.f32 %v114_v27  ;;  %v105_v29 = vmax.f32 %v104_v28, 1e-16 }
 0x140   :  { %v135_v30 = vmul.f32 %v105_v29, %v98_v26 }
 0x141   :  { %v66_v31 = vpop.xlane.xlu0 %65 }
 0x145   :  { %v113_v33 = vpop.xlane.xlu0 %112 }
 0x148   :  { %v192_v32 = vpop.eup %191 }
 0x149   :  { %v116_v34 = vmul.f32 %v192_v32, %v113_v33 }
 0x14b   :  { %v117_v35 = vsel %vm73_vm2, %v116_v34, 0.0 }
 0x14c   :  { %118 = vadd.xlane.f32.xlu1 %v117_v35 }
 0x180   :  { %v61_v36 = vpop.xlane.xlu1 %60 }
 0x181   :  { %193 = vlog2.f32 %v61_v36 }
 0x182   :  { %195 = vrsqrt.f32 %v135_v30 }
 0x184   :  { %v70_v39 = vpop.xlane.xlu1 %69 }
 0x18b   :  { %v194_v37 = vpop.eup %193 }
 0x18c   :  { %v63_v38 = vmul.f32 0.6931472, %v194_v37  ;;  %v196_v43 = vpop.eup %195 }
 0x18e   :  { %v71_v40 = vmul.f32 %v66_v31, %v63_v38 }
 0x190   :  { %v72_v41 = vsub.f32 %v71_v40, %v70_v39 }
 0x192   :  { %v74_v42 = vsel %vm73_vm2, %v72_v41, 0.0 }
 0x193   :  { %75 = vadd.xlane.f32.xlu0 %v74_v42 }
 0x1ac   :  { %v134_v44 = vpop.xlane.xlu1 %133 }
 0x1ad   :  { %v137_v45 = vmul.f32 %v196_v43, %v134_v44 }
 0x1af   :  { %v138_v46 = vsel %vm73_vm2, %v137_v45, 0.0 }
 0x1b0   :  { %139 = vadd.xlane.f32.xlu0 %v138_v46 }
 0x1d9   :  { %v119_v47 = vpop.xlane.xlu1 %118 }
 0x1da   :  { %v120_v48 = vrot.slane %v119_v47, 4 }
 0x1dc   :  { %v121_v49 = vadd.f32 %v120_v48, %v119_v47 }
 0x1de   :  { %v122_v50 = vrot.slane %v121_v49, 2 }
 0x1e0   :  { %v123_v54 = vadd.f32 %v122_v50, %v121_v49 }
 0x1e2   :  { %v124_v57 = vrot.slane %v123_v54, 1 }
 0x1e4   :  { %v125_v60 = vadd.f32 %v124_v57, %v123_v54 }
 0x220   :  { %v76_v51 = vpop.xlane.xlu0 %75 }
 0x221   :  { %v77_v52 = vrot.slane %v76_v51, 4 }
 0x223   :  { %v78_v53 = vadd.f32 %v77_v52, %v76_v51 }
 0x225   :  { %v79_v55 = vrot.slane %v78_v53, 2 }
 0x227   :  { %v80_v56 = vadd.f32 %v79_v55, %v78_v53 }
 0x229   :  { %v81_v58 = vrot.slane %v80_v56, 1 }
 0x22b   :  { %v82_v59 = vadd.f32 %v81_v58, %v80_v56 }
 0x22d   :  { %177 = vpush %v82_v59 }
 0x22e   :  { %179 = vpush %v125_v60 }
 0x23d   :  { %v140_v61 = vpop.xlane.xlu0 %139 }
 0x23e   :  { %v141_v62 = vrot.slane %v140_v61, 4 }
 0x240   :  { %v142_v63 = vadd.f32 %v141_v62, %v140_v61 }
 0x242   :  { %v143_v0 = vrot.slane %v142_v63, 2 }
 0x244   :  { %v144_v1 = vadd.f32 %v143_v0, %v142_v63 }
 0x246   :  { %v145_v2 = vrot.slane %v144_v1, 1 }
 0x248   :  { %v146_v3 = vadd.f32 %v145_v2, %v144_v1 }
 0x24a   :  { %181 = vpush %v146_v3 }
 0x25e   :  { %s178_s2 = spop %177 }
 0x25f   :  { %s180_s21 = spop %179 }
 0x27b   :  { %s182_s22 = spop %181 }
 0x27c   :  { %s148_s23 = sadd.f32 %s182_s22, %s180_s21 }
 0x27e   :  { %s149_s24 = smul.f32 0.05, %s148_s23 }
 0x280   :  { %s150_s27 = sadd.f32 %s178_s2, %s149_s24 }
 0x282   :  { %v158_v7 = vstv %s150_s27 }
 0x283   :  { %v159_v8 = vsel %vm157_vm5, %v158_v7, 0.0 }
 0x284   :  { %160 = vst [vmem:[#allocation8] sm:$0xff] %v159_v8 }
 0x285   :  { %274 = shalt.err (!%p271_p0)
}
 0x286   :  { %s275_s4 = scalar_lea.hbm %s380_s3, 128 }
 0x287   :  { %p276_p1 = scmp.ne.s32.totalorder %s380_s3, %s275_s4  ;;  %p279_p2 = scmp.lt.u32.totalorder %s275_s4, %s380_s3 }
 0x289   :  { %p281_p3 = pnand %p279_p2, %p276_p1 }
 0x28b   :  { %284 = shalt.err (!%p281_p3)
}
 0x28c   :  { %170 = dma.vmem_to_hbm [thread:$0]  %s168_s26, 128, %s380_s3, [#allocation4]  }
 0x28d   :  { %289 = dma.done.wait [#allocation4], 128  }
 0x28e   :  { %290 = vsyncadd [#allocation4], 4294967168 }
 0x28f   :  { %174 = vsyncpa [#allocation3], 1 }
 0x290   :  { %175 = vsyncpa [#allocation6], 1 }
 0x291   :  { %176 = vsyncpa [#allocation4], 1 }

</bundles_post_ra>
